<compile_context>
chip_gen: v7x
topology: tpu7x:2x2x1
jax: 0.10.0
libtpu: 0.0.40
codegen_flags: <defaults>
</compile_context>

<pallas_src>
import jax
import jax.numpy as jnp
from jax.experimental import pallas as pl
from jax.experimental.pallas import tpu as pltpu


def cab_kernel(x1_ref, x2_ref, w1a_ref, w1b_ref, b1_ref, w2_ref, b2_ref, out_ref):
    x1 = x1_ref[...]                                      # (Bb, Cp, HWp)
    x2 = x2_ref[...]                                      # (Bb, Cp, HWp)

    # Raw spatial sums in f32; the 1/(H*W) mean factor is folded into w1a/w1b.
    s1 = jnp.sum(x1.astype(jnp.float32), axis=-1)         # (Bb, Cp)
    s2 = jnp.sum(x2.astype(jnp.float32), axis=-1)         # (Bb, Cp)

    # conv1 (1x1) on the pooled concat, without materializing the concat:
    #   [m1 | m2] @ w1  ==  s1 @ w1a_scaled + s2 @ w1b_scaled
    h = (jnp.dot(s1, w1a_ref[...], preferred_element_type=jnp.float32)
         + jnp.dot(s2, w1b_ref[...], preferred_element_type=jnp.float32)
         + b1_ref[...])
    h = jnp.maximum(h, 0.0)                               # ReLU

    # conv2 + sigmoid; w2/b2 are already expanded to the packed channel layout.
    g = jax.nn.sigmoid(
        jnp.dot(h, w2_ref[...], preferred_element_type=jnp.float32)
        + b2_ref[...])                                     # (Bb, Cp)

    # res = gate * x2 + x1   (gate broadcast over the spatial lane axis)
    out_ref[...] = (g[:, :, None] * x2 + x1).astype(out_ref.dtype)


def _largest_divisor_leq(n, upper):
    upper = max(min(upper, n), 1)
    for d in range(upper, 0, -1):
        if n % d == 0:
            return d
    return 1


def cab_forward(x1, x2, w1, b1, w2, b2):
    """x1, x2: (B, C, H, W).  w1: (2C, C), b1: (C,), w2: (C, C), b2: (C,)."""
    B, C, H, W = x1.shape
    hw = H * W
    inv_hw = 1.0 / hw
    itemsize = jnp.dtype(x1.dtype).itemsize

    # ---- sublane packing: (C, HW) -> (C*k, HW/k) so small-C slabs fill all
    # sublanes.  Pure (free) reshape on the data; fold/expand goes into weights.
    sublanes = {4: 8, 2: 16, 1: 32}.get(itemsize, 8)
    k = 1
    if C < sublanes and sublanes % C == 0:
        cand = sublanes // C
        if cand > 1 and hw % (cand * 128) == 0:
            k = cand
    Cp, hwp = C * k, hw // k

    x1f = x1.reshape(B, Cp, hwp)
    x2f = x2.reshape(B, Cp, hwp)

    # ---- gate weights: split w1 so the kernel never concatenates the pooled
    # vectors; fold the mean scale into w1a/w1b; expand w2/b2 to packed channels.
    f32 = jnp.float32
    w1a = jnp.repeat(w1[:C].astype(f32) * inv_hw, k, axis=0)            # (Cp, C)
    w1b = jnp.repeat(w1[C:].astype(f32) * inv_hw, k, axis=0)            # (Cp, C)
    b1r = jnp.reshape(b1.astype(f32), (1, C))                           # (1, C)
    w2p = jnp.repeat(w2.astype(f32), k, axis=1)                         # (C, Cp)
    b2r = jnp.repeat(jnp.reshape(b2.astype(f32), (1, C)), k, axis=1)    # (1, Cp)
    weight_bytes = 4 * (w1a.size + w1b.size + b1r.size + w2p.size + b2r.size)

    # ---- generation-aware VMEM budget.
    try:
        info = pltpu.get_tpu_info()
        vmem_phys = int(getattr(info, "vmem_capacity_bytes", 0)) or (64 << 20)
    except Exception:
        vmem_phys = 64 << 20                      # conservative fallback
    vmem_cap = max(vmem_phys - (16 << 20), 32 << 20)

    per_batch = Cp * hwp * itemsize               # one batch slab (x1 or x2)
    budget = vmem_cap - 2 * weight_bytes - (4 << 20)
    if budget < 8 * per_batch:
        # TODO(synk): two-phase streaming fallback (emit_pipeline over HW tiles:
        # pooling pass -> in-kernel gate -> apply pass) for per-batch slabs that
        # exceed the per-core VMEM budget; not needed for these shapes.
        raise NotImplementedError(
            "CAB single-pass kernel: one (C, H*W) batch slab exceeds VMEM budget")

    # ---- batch-block size: ~2 MiB blocks, within VMEM, >=2 grid steps when
    # B >= 2 (keeps both v7x TensorCores busy; enables DMA/compute overlap).
    bb_by_vmem = max(budget // (8 * per_batch), 1)
    bb_by_size = max((2 << 20) // per_batch, 1)
    upper = min(bb_by_vmem, bb_by_size, B // 2 if B >= 2 else 1)
    Bb = _largest_divisor_leq(B, upper)
    num_blocks = B // Bb
    block_bytes = Bb * per_batch

    batch_index = lambda b: (b, 0, 0)
    out_spec = pl.BlockSpec((Bb, Cp, hwp), batch_index)
    in_batch_spec = out_spec
    in_buffers = 2
    if block_bytes <= (1 << 20) and num_blocks >= 4 and vmem_phys >= (100 << 20):
        # Triple-buffer tiny input blocks on 128-MiB-VMEM parts (v5e/v6e only).
        try:
            in_batch_spec = pl.BlockSpec((Bb, Cp, hwp), batch_index,
                                         pipeline_mode=pl.Buffered(3))
            in_buffers = 3
        except Exception:
            in_batch_spec = out_spec
            in_buffers = 2

    vmem_needed = ((2 * in_buffers + 2) * block_bytes + 2 * weight_bytes
                   + (4 << 20))
    vmem_limit = int(min(max(vmem_needed, 32 << 20), vmem_cap))

    cost = pl.CostEstimate(
        flops=int(4 * B * C * hw + 6 * B * C * C),
        transcendentals=int(B * C),
        bytes_accessed=int(3 * B * C * hw * itemsize + weight_bytes),
    )

    def wspec(shape):
        return pl.BlockSpec(shape, lambda b: (0, 0))      # resident weights/biases

    out = pl.pallas_call(
        cab_kernel,
        out_shape=jax.ShapeDtypeStruct((B, Cp, hwp), x1.dtype),
        grid=(num_blocks,),
        in_specs=[in_batch_spec, in_batch_spec,
                  wspec((Cp, C)), wspec((Cp, C)), wspec((1, C)),
                  wspec((C, Cp)), wspec((1, Cp))],
        out_specs=out_spec,
        compiler_params=pltpu.CompilerParams(
            dimension_semantics=("parallel",),
            vmem_limit_bytes=vmem_limit,
        ),
        cost_estimate=cost,
    )(x1f, x2f, w1a, w1b, b1r, w2p, b2r)

    return out.reshape(B, C, H, W)


def cab_reference(x1, x2, w1, b1, w2, b2):
    """Plain-JAX reference mirroring the PyTorch module."""
    cat = jnp.concatenate([x1, x2], axis=1)               # (B, 2C, H, W)
    pooled = jnp.mean(cat, axis=(2, 3))                   # (B, 2C)
    h = jnp.maximum(pooled @ w1 + b1, 0.0)                # (B, C)
    g = jax.nn.sigmoid(h @ w2 + b2)                       # (B, C)
    return g[:, :, None, None] * x2 + x1


if __name__ == "__main__":
    key = jax.random.PRNGKey(0)
    k1, k2, k3, k4, k5, k6 = jax.random.split(key, 6)

    # ---- case 1: lane-aligned spatial (H*W = 256; exercises sublane packing) --
    B, C, H, W = 2, 4, 16, 16                              # in_ch = 2C = 8, out_ch = C = 4
    in_ch, out_ch = 2 * C, C

    x1 = jax.random.normal(k1, (B, C, H, W), dtype=jnp.float32)
    x2 = jax.random.normal(k2, (B, C, H, W), dtype=jnp.float32)

    # 1x1-conv weights as (in, out) matmul matrices (transpose of Conv2d layout).
    w1 = 0.2 * jax.random.normal(k3, (in_ch, out_ch), dtype=jnp.float32)
    b1 = 0.1 * jax.random.normal(k4, (out_ch,), dtype=jnp.float32)
    w2 = 0.2 * jax.random.normal(k5, (out_ch, out_ch), dtype=jnp.float32)
    b2 = 0.1 * jax.random.normal(k6, (out_ch,), dtype=jnp.float32)

    out = jax.block_until_ready(cab_forward(x1, x2, w1, b1, w2, b2))
    ref = cab_reference(x1, x2, w1, b1, w2, b2)
    assert out.shape == (B, C, H, W)
    assert jnp.allclose(out, ref, atol=1e-4, rtol=1e-4), "mismatch vs reference (aligned)"

    # ---- case 2: non-aligned spatial (H*W = 135; exercises masked-lane path) --
    H2, W2 = 15, 9
    x1b = jax.random.normal(k1, (B, C, H2, W2), dtype=jnp.float32)
    x2b = jax.random.normal(k2, (B, C, H2, W2), dtype=jnp.float32)

    out_b = jax.block_until_ready(cab_forward(x1b, x2b, w1, b1, w2, b2))
    ref_b = cab_reference(x1b, x2b, w1, b1, w2, b2)
    assert out_b.shape == (B, C, H2, W2)
    assert jnp.allclose(out_b, ref_b, atol=1e-4, rtol=1e-4), "mismatch vs reference (non-aligned)"

    print("KERNEL_OK")
</pallas_src>

<mosaic_0001>
module attributes {stable_mosaic.version = 11 : i64} {
  func.func @cab_kernel(%arg0: i32, %arg1: memref<1x8x128xf32, #tpu.memory_space<vmem>>, %arg2: memref<1x8x128xf32, #tpu.memory_space<vmem>>, %arg3: memref<8x4xf32, #tpu.memory_space<vmem>>, %arg4: memref<8x4xf32, #tpu.memory_space<vmem>>, %arg5: memref<1x4xf32, #tpu.memory_space<vmem>>, %arg6: memref<4x8xf32, #tpu.memory_space<vmem>>, %arg7: memref<1x8xf32, #tpu.memory_space<vmem>>, %arg8: memref<1x8x128xf32, #tpu.memory_space<vmem>>) attributes {dimension_semantics = [#tpu.dimension_semantics<parallel>], iteration_bounds = array<i64: 2>, scalar_prefetch = 0 : i64, scratch_operands = 0 : i64, tpu.core_type = #tpu.core_type<tc>, window_params = [{transform_indices = @transform_0, window_bounds = array<i64: 1, 8, 128>}, {transform_indices = @transform_1, window_bounds = array<i64: 1, 8, 128>}, {pipeline_mode = #tpu.pipeline_mode<synchronous>, transform_indices = @transform_2, window_bounds = array<i64: 8, 4>}, {pipeline_mode = #tpu.pipeline_mode<synchronous>, transform_indices = @transform_3, window_bounds = array<i64: 8, 4>}, {pipeline_mode = #tpu.pipeline_mode<synchronous>, transform_indices = @transform_4, window_bounds = array<i64: 1, 4>}, {pipeline_mode = #tpu.pipeline_mode<synchronous>, transform_indices = @transform_5, window_bounds = array<i64: 4, 8>}, {pipeline_mode = #tpu.pipeline_mode<synchronous>, transform_indices = @transform_6, window_bounds = array<i64: 1, 8>}, {transform_indices = @transform_7, window_bounds = array<i64: 1, 8, 128>}]} {
    %c0 = arith.constant 0 : index
    %c0_0 = arith.constant 0 : index
    %c0_1 = arith.constant 0 : index
    %0 = vector.load %arg1[%c0, %c0_0, %c0_1] : memref<1x8x128xf32, #tpu.memory_space<vmem>>, vector<1x8x128xf32>
    %c0_2 = arith.constant 0 : index
    %c0_3 = arith.constant 0 : index
    %c0_4 = arith.constant 0 : index
    %1 = vector.load %arg2[%c0_2, %c0_3, %c0_4] : memref<1x8x128xf32, #tpu.memory_space<vmem>>, vector<1x8x128xf32>
    %cst = arith.constant dense<0.000000e+00> : vector<1x8xf32>
    %2 = vector.multi_reduction <add>, %0, %cst [2] : vector<1x8x128xf32> to vector<1x8xf32>
    %cst_5 = arith.constant dense<0.000000e+00> : vector<1x8xf32>
    %3 = vector.multi_reduction <add>, %1, %cst_5 [2] : vector<1x8x128xf32> to vector<1x8xf32>
    %c0_6 = arith.constant 0 : index
    %c0_7 = arith.constant 0 : index
    %4 = vector.load %arg3[%c0_6, %c0_7] : memref<8x4xf32, #tpu.memory_space<vmem>>, vector<8x4xf32>
    %cst_8 = arith.constant dense<0.000000e+00> : vector<1x4xf32>
    %5 = tpu.matmul %2, %4, %cst_8 {dimension_numbers = #tpu.dot_dimension_numbers<[1], [0], [0], [1], [0, 0, 1, 1], [], []>} : vector<1x8xf32>, vector<8x4xf32>, vector<1x4xf32> -> vector<1x4xf32>
    %c0_9 = arith.constant 0 : index
    %c0_10 = arith.constant 0 : index
    %6 = vector.load %arg4[%c0_9, %c0_10] : memref<8x4xf32, #tpu.memory_space<vmem>>, vector<8x4xf32>
    %cst_11 = arith.constant dense<0.000000e+00> : vector<1x4xf32>
    %7 = tpu.matmul %3, %6, %cst_11 {dimension_numbers = #tpu.dot_dimension_numbers<[1], [0], [0], [1], [0, 0, 1, 1], [], []>} : vector<1x8xf32>, vector<8x4xf32>, vector<1x4xf32> -> vector<1x4xf32>
    %8 = arith.addf %5, %7 : vector<1x4xf32>
    %c0_12 = arith.constant 0 : index
    %c0_13 = arith.constant 0 : index
    %9 = vector.load %arg5[%c0_12, %c0_13] : memref<1x4xf32, #tpu.memory_space<vmem>>, vector<1x4xf32>
    %10 = arith.addf %8, %9 : vector<1x4xf32>
    %cst_14 = arith.constant 0.000000e+00 : f32
    %11 = vector.broadcast %cst_14 : f32 to vector<1x4xf32>
    %12 = arith.maximumf %10, %11 : vector<1x4xf32>
    %c0_15 = arith.constant 0 : index
    %c0_16 = arith.constant 0 : index
    %13 = vector.load %arg6[%c0_15, %c0_16] : memref<4x8xf32, #tpu.memory_space<vmem>>, vector<4x8xf32>
    %cst_17 = arith.constant dense<0.000000e+00> : vector<1x8xf32>
    %14 = tpu.matmul %12, %13, %cst_17 {dimension_numbers = #tpu.dot_dimension_numbers<[1], [0], [0], [1], [0, 0, 1, 1], [], []>} : vector<1x4xf32>, vector<4x8xf32>, vector<1x8xf32> -> vector<1x8xf32>
    %c0_18 = arith.constant 0 : index
    %c0_19 = arith.constant 0 : index
    %15 = vector.load %arg7[%c0_18, %c0_19] : memref<1x8xf32, #tpu.memory_space<vmem>>, vector<1x8xf32>
    %16 = arith.addf %14, %15 : vector<1x8xf32>
    %17 = arith.negf %16 : vector<1x8xf32>
    %18 = math.exp %17 : vector<1x8xf32>
    %cst_20 = arith.constant 1.000000e+00 : f32
    %19 = vector.broadcast %cst_20 : f32 to vector<1x8xf32>
    %20 = arith.addf %19, %18 : vector<1x8xf32>
    %21 = arith.divf %19, %20 : vector<1x8xf32>
    %22 = vector.shape_cast %21 : vector<1x8xf32> to vector<1x8x1xf32>
    %23 = vector.broadcast %22 : vector<1x8x1xf32> to vector<1x8x128xf32>
    %24 = arith.mulf %23, %1 : vector<1x8x128xf32>
    %25 = arith.addf %24, %0 : vector<1x8x128xf32>
    %c0_21 = arith.constant 0 : index
    %c0_22 = arith.constant 0 : index
    %c0_23 = arith.constant 0 : index
    %26 = vector.load %arg8[%c0_21, %c0_22, %c0_23] : memref<1x8x128xf32, #tpu.memory_space<vmem>>, vector<1x8x128xf32>
    tpu.vector_store %arg8[%c0_21, %c0_22, %c0_23], %25 {strides = array<i32>} : memref<1x8x128xf32, #tpu.memory_space<vmem>>, vector<1x8x128xf32>,
    return
  }
  func.func @transform_0(%arg0: i32) -> (i32, i32, i32) {
    %c0_i32 = arith.constant 0 : i32
    %c0_i32_0 = arith.constant 0 : i32
    %c0_i32_1 = arith.constant 0 : i32
    return %arg0, %c0_i32, %c0_i32_0 : i32, i32, i32
  }
  func.func @transform_1(%arg0: i32) -> (i32, i32, i32) {
    %c0_i32 = arith.constant 0 : i32
    %c0_i32_0 = arith.constant 0 : i32
    %c0_i32_1 = arith.constant 0 : i32
    return %arg0, %c0_i32, %c0_i32_0 : i32, i32, i32
  }
  func.func @transform_2(%arg0: i32) -> (i32, i32) {
    %c0_i32 = arith.constant 0 : i32
    %c0_i32_0 = arith.constant 0 : i32
    %c0_i32_1 = arith.constant 0 : i32
    return %c0_i32, %c0_i32_0 : i32, i32
  }
  func.func @transform_3(%arg0: i32) -> (i32, i32) {
    %c0_i32 = arith.constant 0 : i32
    %c0_i32_0 = arith.constant 0 : i32
    %c0_i32_1 = arith.constant 0 : i32
    return %c0_i32, %c0_i32_0 : i32, i32
  }
  func.func @transform_4(%arg0: i32) -> (i32, i32) {
    %c0_i32 = arith.constant 0 : i32
    %c0_i32_0 = arith.constant 0 : i32
    %c0_i32_1 = arith.constant 0 : i32
    return %c0_i32, %c0_i32_0 : i32, i32
  }
  func.func @transform_5(%arg0: i32) -> (i32, i32) {
    %c0_i32 = arith.constant 0 : i32
    %c0_i32_0 = arith.constant 0 : i32
    %c0_i32_1 = arith.constant 0 : i32
    return %c0_i32, %c0_i32_0 : i32, i32
  }
  func.func @transform_6(%arg0: i32) -> (i32, i32) {
    %c0_i32 = arith.constant 0 : i32
    %c0_i32_0 = arith.constant 0 : i32
    %c0_i32_1 = arith.constant 0 : i32
    return %c0_i32, %c0_i32_0 : i32, i32
  }
  func.func @transform_7(%arg0: i32) -> (i32, i32, i32) {
    %c0_i32 = arith.constant 0 : i32
    %c0_i32_0 = arith.constant 0 : i32
    %c0_i32_1 = arith.constant 0 : i32
    return %arg0, %c0_i32, %c0_i32_0 : i32, i32, i32
  }
}

</mosaic_0001>

<bundles_post_ra>
// kernel: tpu_custom_call.1
= control target key start
LH: loop header
LB: loop body
LE: loop exit
PB: predicated region body
PF: predicated region fallthrough
CT: control target
= control target key end

     0   :  { %12 = vsyncpa [#allocation3], 0  ;;  %s1092_s0 = inlined_call_operand.vmem [shape: f32[2,8,128], index: 0, kind: input, shape index: {}]   ;;  %s1093_s1 = inlined_call_operand.hbm [shape: f32[2,8,128], index: 1, kind: input, shape index: {}]   ;;  %s1094_s2 = inlined_call_operand.vmem [shape: f32[8,4], index: 2, kind: input, shape index: {}]   ;;  %s1095_s3 = inlined_call_operand.vmem [shape: f32[8,4], index: 3, kind: input, shape index: {}]   ;;  %s1096_s4 = inlined_call_operand.vmem [shape: f32[1,4], index: 4, kind: input, shape index: {}]   ;;  %s1097_s5 = inlined_call_operand.vmem [shape: f32[4,8], index: 5, kind: input, shape index: {}]   ;;  %s1098_s6 = inlined_call_operand.vmem [shape: f32[1,8], index: 6, kind: input, shape index: {}]   ;;  %s1099_s7 = inlined_call_operand.hbm [shape: f32[2,8,128], index: 7, kind: output, shape index: {}]  }
   0x1   :  { %14 = vsyncpa [#allocation3 + $0x1], 0 }
   0x2   :  { %15 = vsyncpa [#allocation4], 0 }
   0x3   :  { %17 = vsyncpa [#allocation4 + $0x1], 0  ;;  %s904_s24 = smov 0   ;;  %s906_s25 = smov 0  }
   0x4   :  { %s908_s26 = smov 0   ;;  %s910_s27 = smov 0  }
   0x5 LB: > { %s925_s28 = sadd.s32 4294967295, %s858_s27   ;;  %s671_s29 = sadd.s32 4294967294, %s858_s27   ;;  %s858_s27 = sphi %s910_s27, %s1114_s27   ;;  %s854_s26 = sphi %s908_s26, %s1113_s26   ;;  %s850_s25 = sphi %s906_s25, %s1112_s25   ;;  %s846_s24 = sphi %s904_s24, %s1111_s24  }
   0x6   : > { %s929_s30 = sadd.s32 1, %s858_s27   ;;  %s56_s8 = sadd.s32 1, %s854_s26 }
   0x7   : > { %s53_s9 = ssub.s32 %s858_s27, %s929_s30  ;;  %p63_p0 = scmp.ne.s32.totalorder %s854_s26, %s850_s25 }
   0x8   : > { %p54_p1 = scmp.eq.s32.totalorder %s53_s9, 0  ;;  %p64_p2 = scmp.eq.s32.totalorder %s858_s27, 0 }
   0x9   : > { %p69_p3 = scmp.ne.s32.totalorder %s850_s25, %s846_s24  ;;  %p70_p4 = scmp.eq.s32.totalorder %s925_s28, 0 }
   0xa   : > { %s941_s10 = scalar_select %p54_p1, %s854_s26, %s56_s8  }
   0xb   : > { %p943_p5 = por %p64_p2, %p63_p0  ;;  %p947_p6 = por %p70_p4, %p69_p3 }
   0xc   : > { %p198_p7 = scmp.eq.s32.totalorder %s925_s28, 1  ;;  %p204_p8 = scmp.eq.s32.totalorder %s671_s29, 1 }
   0xd   : > { %p722_p10 = scmp.lt.s32.totalorder %s858_s27, 2  ;;  %s246_s15 = sand.u32 1, %s854_s26  }
   0xe   : > { %p954_p11 = por %p198_p7, %p63_p0  ;;  %p958_p12 = por %p204_p8, %p69_p3 }
   0xf   : > { %s675_s16 = sshll.u32 %s858_s27, 7  ;;  %s674_s17 = sshll.u32 %s246_s15, 3 }
  0x10   : > { %s1103_s13 = scalar_select %p954_p11, 1, 0 }
  0x11   : > { %s1104_s14 = scalar_select %p958_p12, 1, 0 }
  0x12   : > { %s967_s20 = scalar_lea.hbm %s1093_s1, %s675_s16  ;;  %s250_s21 = scalar_lea.vmem [#allocation2], %s674_s17 }
  0x13   : > { %s257_s22 = sshll.u32 %s250_s21, 4  ;;  %p971_p13 = pnand %p722_p10, %p943_p5  ;;  %s975_s22 = int_to_ptr.vmem [resolvable:$true] %s257_s22 }
  0x14   : > { %s247_s29 = scalar_lea.sflag [#allocation3], %s246_s15  ;;  %s762_s8 = scalar_lea.hbm %s967_s20, 128 }
  0x15   : > { %p763_p2 = scmp.ne.s32.totalorder %s967_s20, %s762_s8  ;;  %p764_p3 = pneg %p971_p13 }
  0x16   : > { %s767_s16 = scalar_lea.hbm %s1093_s1, 256  ;;  %p768_p5 = scmp.lt.u32.totalorder %s967_s20, %s1093_s1 }
  0x17   : > { %p765_p4 = pnand %p764_p3, %p763_p2  ;;  %p769_p8 = scmp.lt.u32.totalorder %s767_s16, %s762_s8 }
  0x18   : > { %p771_p9 = scmp.lt.u32.totalorder %s762_s8, %s967_s20 }
  0x19   : > { %p766_p7 = pneg %p765_p4  ;;  %p770_p10 = por %p769_p8, %p768_p5 }
  0x1b   : > { %p772_p0 = por %p771_p9, %p770_p10 }
  0x1d   : > { %p773_p1 = pnand %p772_p0, %p766_p7 }
  0x1f   : > { %776 = shalt.err (!%p773_p1)
}
  0x20   : > { %s777_s15 = scalar_lea.vmem %s975_s22, 128  ;;  %s860_s19 = smov [#allocation2]  }
  0x21   : > { %p778_p2 = scmp.ne.s32.totalorder %s975_s22, %s777_s15  ;;  %s782_s21 = sshll.u32 %s860_s19, 4  ;;  %s783_s21 = int_to_ptr.vmem [resolvable:$false] %s782_s21 }
  0x22   : > { %s784_s9 = scalar_lea.vmem %s783_s21, 256  ;;  %p785_p11 = scmp.lt.s32.totalorder %s975_s22, %s783_s21 }
  0x23   : > { %p780_p4 = pnand %p778_p2, %p764_p3  ;;  %p786_p5 = scmp.lt.s32.totalorder %s784_s9, %s777_s15 }
  0x25   : > { %p781_p12 = pneg %p780_p4  ;;  %p787_p8 = por %p786_p5, %p785_p11 }
  0x27   : > { %p788_p9 = pnand %p787_p8, %p781_p12 }
  0x29   : > { %791 = shalt.err (!%p788_p9)
}
  0x2a   : > { %717 = dma.hbm_to_vmem [thread:$0]  (!%p971_p13), %s967_s20, 128, %s975_s22, %s247_s29  }
  0x2b   : > { %p1106_p0 = scmp.lt.s32.totalorder %s858_s27, 3  ;;  %p1107_p1 = scmp.ge.s32.totalorder %s858_s27, 1 }
  0x2d   : > { %p263_p3 = pnand %p1107_p1, %p1106_p0 }
  0x2e   : > { %s1009_s8 = sand.u32 (!%p263_p3), 1, %s850_s25  }
  0x2f   : > { %266 = sbr.rel (%p263_p3) target bundleno = 803 (0x323), region = 48  ;;  %s677_s11 = sshll.u32 (!%p263_p3), %s1009_s8, 3 }
  0x30   : > { %s269_s16 = scalar_lea.sflag (!%p263_p3), [#allocation3], %s1009_s8  ;;  %s272_s23 = scalar_lea.vmem (!%p263_p3), [#allocation2], %s677_s11 }
  0x36   : > { %837 = dma.done.wait (%p947_p6), %s269_s16, 128  }
  0x37   : > { %839 = vsyncadd (%p947_p6), %s269_s16, 4294967168  ;;  %p307_p11 = scmp.lt.s32.totalorder %s925_s28, 1  ;;  %v312_v1 = vld [vmem:[%s272_s23] sm:$0xff]  ;;  %v861_v2 = vmov 0.0   ;;  %vm862_vm0 = vmmov 0   ;;  %v320_v5 = vlaneseq  ;;  %vm326_vm1 = vcmask 64512  }
  0x38   : > { %700 = vmatprep.subr.mxu1 %v861_v2  ;;  %v317_v3 = vld [vmem:[%s1094_s2] sm:$0xff]  ;;  %695 = vmatprep.subr.mxu0 %v861_v2  ;;  %vm485_vm2 = vcmask 1043456   ;;  %vm481_vm3 = vcmask 31744   ;;  %s686_s17 = sshll.u32 %s925_s28, 7  ;;  %s576_s9 = scalar_lea.sflag [#allocation4], %s1009_s8 }
  0x39   : > { %s308_s20 = scalar_select %p307_p11, %s925_s28, 1  ;;  %701 = vmatpush3.msra.mxu1 %v317_v3  ;;  %702 = vmatprep.mubr.msk.f32.mxu1 %vm862_vm0, %v861_v2  ;;  %v318_v4 = vld [vmem:[%s1095_s3] sm:$0xff]  ;;  %v321_v6 = vand.u32 127, %v320_v5  ;;  %v323_v7 = vshrl.u32 %v320_v5, 7 }
  0x3a   : > { %697 = vmatprep.mubr.msk.f32.mxu0 %vm862_vm0, %v861_v2  ;;  %696 = vmatpush3.msra.mxu0 %v318_v4  ;;  %v479_v13 = vld [vmem:[%s1097_s5] sm:$0xf]  ;;  %s1048_s21 = scalar_lea.hbm %s1099_s7, %s686_s17  ;;  %p1108_p12 = scmp.ne.s32.totalorder %s1103_s13, 0 }
  0x3b   : > { %s679_s22 = sshll.u32 %s308_s20, 3  ;;  %705 = vmatprep.subr.mxu0 %v861_v2  ;;  %v324_v8 = vsub.s32 %v321_v6, %v323_v7  ;;  %v476_v17 = vld [vmem:[%s1096_s4] sm:$0x1]  ;;  %v567_v29 = vsub.s32 0, %v323_v7  ;;  %s863_s28 = smov [#allocation5]  }
  0x3c   : > { %s310_s18 = scalar_lea.vmem %s1092_s0, %s679_s22  ;;  %v480_v22 = vld [vmem:[%s1098_s6] sm:$0x1] }
  0x3d   : > { %v311_v0 = vld [vmem:[%s310_s18] sm:$0xff]  ;;  %s306_s18 = scalar_lea.vmem [#allocation5], %s677_s11  ;;  %s796_s11 = sshll.u32 %s863_s28, 4  ;;  %s797_s11 = int_to_ptr.vmem [resolvable:$false] %s796_s11 }
  0x3e   : > { %313 = vadd.xlane.f32.xlu0 %v311_v0  ;;  %s589_s15 = sshll.u32 %s306_s18, 4  ;;  %s798_s23 = scalar_lea.vmem %s797_s11, 256  ;;  %s1050_s15 = int_to_ptr.vmem [resolvable:$true] %s589_s15 }
  0x3f   : > { %s792_s16 = scalar_lea.vmem %s1050_s15, 128  ;;  %p799_p10 = scmp.lt.s32.totalorder %s1050_s15, %s797_s11 }
  0x40   : > { %p793_p6 = scmp.ne.s32.totalorder %s1050_s15, %s792_s16  ;;  %p800_p2 = scmp.lt.s32.totalorder %s798_s23, %s792_s16 }
  0x42   : > { %315 = vadd.xlane.f32.xlu0 %v312_v1  ;;  %p794_p13 = pnand %p793_p6, %p1108_p12  ;;  %p801_p4 = por %p800_p2, %p799_p10 }
  0x44   : > { %p795_p7 = pneg %p794_p13 }
  0x46   : > { %p802_p5 = pnand %p801_p4, %p795_p7 }
  0xcb   : > { %v314_v9 = vpop.xlane.xlu0 %313 }
  0xcc   : > { %v403_v10 = vrot.slane %v314_v9, %v324_v8 }
  0xce   : > { %703 = vmatmul.mubr.msk.f32.vlgmr.msra.gmra.mrb[0].mxu1 %vm326_vm1, %v403_v10 }
  0xcf   : > { %v316_v11 = vpop.xlane.xlu0 %315 }
  0xd0   : > { %v325_v12 = vrot.slane %v316_v11, %v324_v8 }
  0xd2   : > { %698 = vmatmul.mubr.msk.f32.vlgmr.msra.gmra.mrb[0].mxu0 %vm326_vm1, %v325_v12 }
  0xd3   : > { %707 = vmatprep.mubr.msk.f32.mxu0 %vm862_vm0, %v861_v2  ;;  %706 = vmatpush3.msk.msra.mxu0 %vm485_vm2, %v479_v13 }
 0x1a1   : > { %v472_v14 = vpop.f32.mrb[0].mxu1 }
 0x1a2   : > { %v704_v15 = vpop.f32.mrb[1].mxu1 }
 0x1a5   : > { %v395_v16 = vpop.f32.mrb[0].mxu0 }
 0x1a6   : > { %v473_v18 = vadd.f32 %v472_v14, %v395_v16  ;;  %v699_v19 = vpop.f32.mrb[1].mxu0 }
 0x1a8   : > { %v477_v20 = vadd.f32 %v476_v17, %v473_v18 }
 0x1aa   : > { %v478_v21 = vmax.f32 %v477_v20, 0.0 }
 0x1ac   : > { %708 = vmatmul.mubr.msk.f32.vlgmr.msra.gmra.mrb[2].mxu0 %vm481_vm3, %v478_v21 }
 0x27f   : > { %v555_v23 = vpop.f32.mrb[2].mxu0 }
 0x280   : > { %v556_v24 = vadd.f32 %v555_v23, %v480_v22  ;;  %v709_v25 = vpop.f32.mrb[3].mxu0 }
 0x282   : > { %v684_v26 = vmul.f32 -1.442695, %v556_v24 }
 0x284   : > { %758 = vpow2.f32 %v684_v26 }
 0x28e   : > { %v759_v27 = vpop.eup %758 }
 0x28f   : > { %v562_v28 = vadd.f32 1.0, %v759_v27 }
 0x291   : > { %760 = vrcp.f32 %v562_v28 }
 0x29b   : > { %v761_v30 = vpop.eup %760 }
 0x29c   : > { %v568_v31 = vrot.slane %v761_v30, %v567_v29 }
 0x29e   : > { %570 = vbcast.lane.b32.xlu1 %v568_v31, 256 }
 0x310   : > { %v571_v32 = vpop.permute.xlu1 %570 }
 0x311   : > { %v572_v33 = vmul.f32 %v571_v32, %v312_v1 }
 0x313   : > { %v573_v34 = vadd.f32 %v572_v33, %v311_v0 }
 0x315   : > { %574 = vst [vmem:[%s306_s18] sm:$0xff] %v573_v34 }
 0x316   : > { %805 = shalt.err (!%p802_p5)
}
 0x317   : > { %s806_s8 = scalar_lea.hbm %s1048_s21, 128  ;;  %s810_s29 = scalar_lea.hbm %s1099_s7, 256 }
 0x318   : > { %p807_p8 = scmp.ne.s32.totalorder %s1048_s21, %s806_s8  ;;  %p811_p1 = scmp.lt.u32.totalorder %s1048_s21, %s1099_s7 }
 0x319   : > { %p812_p3 = scmp.lt.u32.totalorder %s810_s29, %s806_s8  ;;  %p814_p6 = scmp.lt.u32.totalorder %s806_s8, %s1048_s21 }
 0x31a   : > { %p808_p9 = pnand %p807_p8, %p1108_p12 }
 0x31b   : > { %p813_p11 = por %p812_p3, %p811_p1 }
 0x31c   : > { %p809_p0 = pneg %p808_p9 }
 0x31d   : > { %p815_p13 = por %p814_p6, %p813_p11 }
 0x31f   : > { %p816_p7 = pnand %p815_p13, %p809_p0 }
 0x321   : > { %819 = shalt.err (!%p816_p7)
}
 0x322   : > { %712 = dma.vmem_to_hbm [thread:$0]  (%p1108_p12), %s1050_s15, 128, %s1048_s21, %s576_s9  }
 0x323 PF: > { %s601_s19 = sand.u32 1, %s846_s24   ;;  %p1109_p10 = scmp.ne.s32.totalorder %s1104_s14, 0 }
 0x324   : > { %p1110_p2 = scmp.ge.s32.totalorder %s858_s27, 2  ;;  %s602_s12 = scalar_lea.sflag [#allocation4], %s601_s19 }
 0x326   : > { %p719_p4 = pnand %p1110_p2, %p1109_p10 }
 0x328   : > { %841 = dma.done.wait (!%p719_p4), %s602_s12, 128  }
 0x329   : > { %843 = vsyncadd (!%p719_p4), %s602_s12, 4294967168  ;;  %p20_p5 = scmp.ge.s32.totalorder %s929_s30, 4   ;;  %s1111_s24 = smov %s850_s25 }
 0x32a   : > { %s1112_s25 = smov %s854_s26  ;;  %s1113_s26 = smov %s941_s10 }
 0x32b   : > { %s1114_s27 = smov %s929_s30  ;;  %22 = sbr.rel (!%p20_p5) target bundleno = 5 (0x5), region = 96 }
 0x332   :  { %607 = vsyncpa [#allocation3], 1 }
 0x333   :  { %609 = vsyncpa [#allocation3 + $0x1], 1 }
 0x334   :  { %610 = vsyncpa [#allocation4], 1 }
 0x335   :  { %612 = vsyncpa [#allocation4 + $0x1], 1 }

</bundles_post_ra>
